<compile_context>
chip_gen: v7x
topology: tpu7x:2x2x1
jax: 0.10.0
libtpu: 0.0.40
codegen_flags: <defaults>
</compile_context>

<pallas_src>
import functools

import jax
import jax.numpy as jnp
from jax.experimental import pallas as pl
from jax.experimental.pallas import tpu as pltpu

_COMPUTE_DTYPE = jnp.bfloat16          # MXU operand dtype (f32 accumulate)
_VMEM_LIMIT = 32 * 1024 * 1024         # < v7x's 64 MiB physical per-TC VMEM


def _round_up(x, m):
    return ((x + m - 1) // m) * m


# ---------------------------------------------------------------------------
# Trace-time weight / selection-matrix construction (tiny, pure jnp).
# ---------------------------------------------------------------------------
def _banded_conv_weight(w_hwio, w_in, w_out, stride, scale=None, k_pad=None,
                        n_pad=None, dtype=_COMPUTE_DTYPE):
    """Block-banded (Toeplitz) weight folding the 3-tap width conv (pad=1).

    Returns (3, K, N): K = w_in*Cin (zero-padded to k_pad), N = w_out*Cout
    (zero-padded to n_pad).  band[ky][xi*Cin+ci, xo*Cout+co] = w[ky,kx,ci,co]
    with kx = xi - stride*xo + 1 when 0 <= kx < 3 (width zero-padding is
    equivalent to clipping the band at the edges).
    """
    kh, kw, cin, cout = w_hwio.shape
    w = w_hwio.astype(jnp.float32)
    if scale is not None:
        w = w * scale.reshape(1, 1, 1, cout).astype(jnp.float32)
    p = jnp.arange(w_in)[:, None]
    q = jnp.arange(w_out)[None, :]
    bands = []
    for ky in range(kh):
        acc = jnp.zeros((w_in, cin, w_out, cout), jnp.float32)
        for kx in range(kw):
            e = (p == stride * q + kx - 1).astype(jnp.float32)   # (w_in, w_out)
            acc = acc + jnp.einsum("pq,ic->piqc", e, w[ky, kx])
        bands.append(acc.reshape(w_in * cin, w_out * cout))
    band = jnp.stack(bands, axis=0)
    if k_pad is not None and k_pad > band.shape[1]:
        band = jnp.pad(band, ((0, 0), (0, k_pad - band.shape[1]), (0, 0)))
    if n_pad is not None and n_pad > band.shape[2]:
        band = jnp.pad(band, ((0, 0), (0, 0), (0, n_pad - band.shape[2])))
    return band.astype(dtype)


def _stride2_row_select(ho, hp, dtype):
    """(3*ho, hp) 0/1 matrix; row ky*ho+yo selects padded input row 2*yo+ky."""
    yo = jnp.arange(ho)[:, None]
    p = jnp.arange(hp)[None, :]
    return jnp.concatenate(
        [(p == 2 * yo + ky).astype(dtype) for ky in range(3)], axis=0)


# ---------------------------------------------------------------------------
# Fused kernel: conv1+BN+ReLU -> conv2+BN+ReLU -> stride-2 conv, one batch
# element per grid step.  Every GEMM operand and every store is lane-dense.
# ---------------------------------------------------------------------------
def _down_fused_kernel(x_ref, w1_ref, b1_ref, w2_ref, b2_ref, w3_ref, sel_ref,
                       x1_ref, res_ref, h_scr, x1_scr, *, h, ho):
    f32 = jnp.float32

    # --- conv1 + folded-BN bias + ReLU (banded-weight GEMM, 3 row taps) ---
    x = x_ref[...]                                       # (Hp, Kxp) bf16
    acc = jnp.dot(x[0:h], w1_ref[0], preferred_element_type=f32)
    acc = acc + jnp.dot(x[1:h + 1], w1_ref[1], preferred_element_type=f32)
    acc = acc + jnp.dot(x[2:h + 2], w1_ref[2], preferred_element_type=f32)
    hval = jnp.maximum(acc + b1_ref[...], 0.0)           # (H, W*C1) f32

    h_scr[...] = jnp.zeros_like(h_scr)                   # zero halo rows
    h_scr[1:h + 1, :] = hval.astype(h_scr.dtype)

    # --- conv2 + folded-BN bias + ReLU (h never leaves VMEM) --------------
    hpad = h_scr[...]                                    # (Hp, W*C1) bf16
    acc = jnp.dot(hpad[0:h], w2_ref[0], preferred_element_type=f32)
    acc = acc + jnp.dot(hpad[1:h + 1], w2_ref[1], preferred_element_type=f32)
    acc = acc + jnp.dot(hpad[2:h + 2], w2_ref[2], preferred_element_type=f32)
    x1 = jnp.maximum(acc + b2_ref[...], 0.0)             # (H, W*C2) f32

    x1_ref[...] = x1.astype(x1_ref.dtype)                # lane-dense skip store

    x1_scr[...] = jnp.zeros_like(x1_scr)
    x1_scr[1:h + 1, :] = x1.astype(x1_scr.dtype)

    # --- conv3 (3x3, stride 2) epilogue while x1 is still in VMEM ---------
    # Row subsampling via a 0/1 selection matmul (no strided loads); the
    # width stride is folded into the banded weight w3.
    x1p = x1_scr[...]                                    # (Hp, W*C2) bf16
    taps = jnp.dot(sel_ref[...], x1p, preferred_element_type=f32)
    taps = taps.astype(x1p.dtype)                        # exact (0/1 selection)
    acc = jnp.dot(taps[0:ho], w3_ref[0], preferred_element_type=f32)
    acc = acc + jnp.dot(taps[ho:2 * ho], w3_ref[1], preferred_element_type=f32)
    acc = acc + jnp.dot(taps[2 * ho:3 * ho], w3_ref[2],
                        preferred_element_type=f32)
    res_ref[...] = acc.astype(res_ref.dtype)             # (Ho, Wo*C3 pad 128)


# ---------------------------------------------------------------------------
# Down.forward equivalent (NCHW in / NCHW out, lane-dense NHWC internally).
# ---------------------------------------------------------------------------
def down_forward(x_nchw, p):
    N, Cin, H, W = x_nchw.shape
    C1 = p["w1"].shape[-1]
    C2 = p["w2"].shape[-1]
    C3 = p["w3"].shape[-1]
    Ho = (H - 1) // 2 + 1
    Wo = (W - 1) // 2 + 1

    Hp = _round_up(H + 2, 8)              # row-padded height (sublane aligned)
    Kx = W * Cin
    Kxp = _round_up(Kx, 128)              # lane-dense, padded to full vreg width
    N1 = W * C1                           # = 128 for W=16, C1=8
    N2 = W * C2                           # = 128
    N3 = Wo * C3                          # = 64
    N3p = _round_up(N3, 128)              # unmasked store, sliced in wrapper

    # Lane-dense, row-padded input slab: (N, Hp, Kxp).
    x_rows = jnp.transpose(x_nchw, (0, 2, 3, 1)).reshape(N, H, Kx)
    x_rows = jnp.pad(x_rows, ((0, 0), (1, Hp - H - 1), (0, Kxp - Kx)))
    x_rows = x_rows.astype(_COMPUTE_DTYPE)

    # Banded (Toeplitz) conv weights, BN scale folded; per-lane bias vectors.
    w1b = _banded_conv_weight(p["w1"], W, W, 1, scale=p["s1"], k_pad=Kxp)
    w2b = _banded_conv_weight(p["w2"], W, W, 1, scale=p["s2"])
    w3b = _banded_conv_weight(p["w3"], W, Wo, 2, n_pad=N3p)
    b1l = jnp.tile(p["b1"], W).reshape(1, N1).astype(jnp.float32)
    b2l = jnp.tile(p["b2"], W).reshape(1, N2).astype(jnp.float32)
    sel = _stride2_row_select(Ho, Hp, _COMPUTE_DTYPE)

    # VMEM fit-guard for the whole-image-resident design (double-buffered
    # inputs + scratch), so large images fail loudly instead of OOM-ing.
    bs = 2
    block_bytes = (Hp * Kxp * bs
                   + 3 * (Kxp * N1 + N1 * N2 + N2 * N3p) * bs
                   + (N1 + N2) * 4 + 3 * Ho * Hp * bs
                   + H * N2 * 4 + Ho * N3p * 4)
    scratch_bytes = Hp * (N1 + N2) * bs
    if 2 * block_bytes + scratch_bytes > _VMEM_LIMIT // 2:
        raise ValueError("Down fused kernel: image too large for the "
                         "whole-image-resident design; needs halo-tiled "
                         "row blocking.")

    x1, res = pl.pallas_call(
        functools.partial(_down_fused_kernel, h=H, ho=Ho),
        out_shape=(
            jax.ShapeDtypeStruct((N, H, N2), jnp.float32),     # x1, lane-dense
            jax.ShapeDtypeStruct((N, Ho, N3p), jnp.float32),   # downsample
        ),
        grid_spec=pltpu.PrefetchScalarGridSpec(
            num_scalar_prefetch=0,
            grid=(N,),
            in_specs=[
                pl.BlockSpec((None, Hp, Kxp), lambda b: (b, 0, 0)),
                pl.BlockSpec((3, Kxp, N1), lambda b: (0, 0, 0)),
                pl.BlockSpec((1, N1), lambda b: (0, 0)),
                pl.BlockSpec((3, N1, N2), lambda b: (0, 0, 0)),
                pl.BlockSpec((1, N2), lambda b: (0, 0)),
                pl.BlockSpec((3, N2, N3p), lambda b: (0, 0, 0)),
                pl.BlockSpec((3 * Ho, Hp), lambda b: (0, 0)),
            ],
            out_specs=[
                pl.BlockSpec((None, H, N2), lambda b: (b, 0, 0)),
                pl.BlockSpec((None, Ho, N3p), lambda b: (b, 0, 0)),
            ],
            scratch_shapes=[
                pltpu.VMEM((Hp, N1), _COMPUTE_DTYPE),
                pltpu.VMEM((Hp, N2), _COMPUTE_DTYPE),
            ]),
        compiler_params=pltpu.CompilerParams(
            dimension_semantics=("parallel",),
            vmem_limit_bytes=_VMEM_LIMIT),
    )(x_rows, w1b, b1l, w2b, b2l, w3b, sel)

    # PixelShuffle(2) fused with the NHWC->NCHW conversion (one permute).
    C4 = C2 // 4
    skip = x1.reshape(N, H, W, C4, 2, 2)
    skip = jnp.transpose(skip, (0, 3, 1, 4, 2, 5)).reshape(N, C4, 2 * H, 2 * W)
    skip = skip.astype(jnp.float32)

    result = res[:, :, :N3].reshape(N, Ho, Wo, C3)
    result = jnp.transpose(result, (0, 3, 1, 2))          # NHWC -> NCHW
    return result, skip


# ---------------- reference (pure JAX, f32) for correctness check ------------
def _ref_conv(x_nhwc, w_hwio, scale, bias, stride, relu):
    y = jax.lax.conv_general_dilated(
        x_nhwc, w_hwio, window_strides=(stride, stride),
        padding=((1, 1), (1, 1)),
        dimension_numbers=("NHWC", "HWIO", "NHWC"))
    if scale is not None:
        y = y * scale.reshape(1, 1, 1, -1) + bias.reshape(1, 1, 1, -1)
    if relu:
        y = jnp.maximum(y, 0.0)
    return y


def _pixel_shuffle_nchw(x, r):
    N, C, H, W = x.shape
    x = x.reshape(N, C // (r * r), r, r, H, W)
    x = x.transpose(0, 1, 4, 2, 5, 3)
    return x.reshape(N, C // (r * r), H * r, W * r)


def _ref_forward(x_nchw, p):
    x = jnp.transpose(x_nchw, (0, 2, 3, 1))
    h = _ref_conv(x, p["w1"], p["s1"], p["b1"], 1, True)
    x1 = _ref_conv(h, p["w2"], p["s2"], p["b2"], 1, True)
    res = _ref_conv(x1, p["w3"], None, None, 2, False)
    skip = _pixel_shuffle_nchw(jnp.transpose(x1, (0, 3, 1, 2)), 2)
    return jnp.transpose(res, (0, 3, 1, 2)), skip


if __name__ == "__main__":
    key = jax.random.PRNGKey(0)
    ks = jax.random.split(key, 12)

    N, Cin, H, W = 2, 4, 16, 16
    Cout = 8                                  # divisible by 4 (PixelShuffle r=2)
    eps = 1e-5

    x = jax.random.normal(ks[0], (N, Cin, H, W), jnp.float32)

    def oihw_to_hwio(w):
        return jnp.transpose(w, (2, 3, 1, 0))

    w1 = 0.1 * jax.random.normal(ks[1], (Cout, Cin, 3, 3), jnp.float32)
    w2 = 0.1 * jax.random.normal(ks[2], (Cout, Cout, 3, 3), jnp.float32)
    w3 = 0.1 * jax.random.normal(ks[3], (Cout, Cout, 3, 3), jnp.float32)

    def bn_fold(kg, kb, km, kv):
        gamma = 1.0 + 0.1 * jax.random.normal(kg, (Cout,), jnp.float32)
        beta = 0.1 * jax.random.normal(kb, (Cout,), jnp.float32)
        mean = 0.1 * jax.random.normal(km, (Cout,), jnp.float32)
        var = jax.random.uniform(kv, (Cout,), jnp.float32, 0.5, 1.5)
        scale = gamma / jnp.sqrt(var + eps)
        bias = beta - mean * scale
        return scale, bias

    s1, b1 = bn_fold(ks[4], ks[5], ks[6], ks[7])
    s2, b2 = bn_fold(ks[8], ks[9], ks[10], ks[11])

    params = {
        "w1": oihw_to_hwio(w1), "s1": s1, "b1": b1,
        "w2": oihw_to_hwio(w2), "s2": s2, "b2": b2,
        "w3": oihw_to_hwio(w3),
    }

    result, skip = jax.jit(down_forward)(x, params)
    jax.block_until_ready((result, skip))

    assert result.shape == (N, Cout, H // 2, W // 2), result.shape
    assert skip.shape == (N, Cout // 4, 2 * H, 2 * W), skip.shape

    ref_result, ref_skip = _ref_forward(x, params)
    # bf16 MXU operands (f32 accumulate) -> bf16-appropriate tolerance vs f32 ref.
    assert jnp.allclose(result, ref_result, atol=5e-2, rtol=5e-2), \
        float(jnp.max(jnp.abs(result - ref_result)))
    assert jnp.allclose(skip, ref_skip, atol=5e-2, rtol=5e-2), \
        float(jnp.max(jnp.abs(skip - ref_skip)))

    print("KERNEL_OK")
</pallas_src>

<mosaic_0001>
module attributes {stable_mosaic.version = 11 : i64} {
  func.func @_down_fused_kernel(%arg0: i32, %arg1: memref<1x24x128xbf16, #tpu.memory_space<vmem>>, %arg2: memref<3x128x128xbf16, #tpu.memory_space<vmem>>, %arg3: memref<1x128xf32, #tpu.memory_space<vmem>>, %arg4: memref<3x128x128xbf16, #tpu.memory_space<vmem>>, %arg5: memref<1x128xf32, #tpu.memory_space<vmem>>, %arg6: memref<3x128x128xbf16, #tpu.memory_space<vmem>>, %arg7: memref<24x24xbf16, #tpu.memory_space<vmem>>, %arg8: memref<1x16x128xf32, #tpu.memory_space<vmem>>, %arg9: memref<1x8x128xf32, #tpu.memory_space<vmem>>, %arg10: memref<24x128xbf16, #tpu.memory_space<vmem>>, %arg11: memref<24x128xbf16, #tpu.memory_space<vmem>>) attributes {dimension_semantics = [#tpu.dimension_semantics<parallel>], iteration_bounds = array<i64: 2>, scalar_prefetch = 0 : i64, scratch_operands = 2 : i64, tpu.core_type = #tpu.core_type<tc>, window_params = [{transform_indices = @transform_0, window_bounds = array<i64: 1, 24, 128>}, {pipeline_mode = #tpu.pipeline_mode<synchronous>, transform_indices = @transform_1, window_bounds = array<i64: 3, 128, 128>}, {pipeline_mode = #tpu.pipeline_mode<synchronous>, transform_indices = @transform_2, window_bounds = array<i64: 1, 128>}, {pipeline_mode = #tpu.pipeline_mode<synchronous>, transform_indices = @transform_3, window_bounds = array<i64: 3, 128, 128>}, {pipeline_mode = #tpu.pipeline_mode<synchronous>, transform_indices = @transform_4, window_bounds = array<i64: 1, 128>}, {pipeline_mode = #tpu.pipeline_mode<synchronous>, transform_indices = @transform_5, window_bounds = array<i64: 3, 128, 128>}, {pipeline_mode = #tpu.pipeline_mode<synchronous>, transform_indices = @transform_6, window_bounds = array<i64: 24, 24>}, {transform_indices = @transform_7, window_bounds = array<i64: 1, 16, 128>}, {transform_indices = @transform_8, window_bounds = array<i64: 1, 8, 128>}]} {
    %c0 = arith.constant 0 : index
    %c0_0 = arith.constant 0 : index
    %c0_1 = arith.constant 0 : index
    %0 = vector.load %arg1[%c0, %c0_0, %c0_1] : memref<1x24x128xbf16, #tpu.memory_space<vmem>>, vector<1x24x128xbf16>
    %1 = vector.shape_cast %0 : vector<1x24x128xbf16> to vector<24x128xbf16>
    %2 = vector.extract_strided_slice %1 {offsets = [0, 0], sizes = [16, 128], strides = [1, 1]} : vector<24x128xbf16> to vector<16x128xbf16>
    %c0_2 = arith.constant 0 : index
    %c0_3 = arith.constant 0 : index
    %c0_4 = arith.constant 0 : index
    %3 = vector.load %arg2[%c0_2, %c0_3, %c0_4] : memref<3x128x128xbf16, #tpu.memory_space<vmem>>, vector<1x128x128xbf16>
    %4 = vector.shape_cast %3 : vector<1x128x128xbf16> to vector<128x128xbf16>
    %cst = arith.constant dense<0.000000e+00> : vector<16x128xf32>
    %5 = tpu.matmul %2, %4, %cst {dimension_numbers = #tpu.dot_dimension_numbers<[1], [0], [0], [1], [0, 0, 1, 1], [], []>} : vector<16x128xbf16>, vector<128x128xbf16>, vector<16x128xf32> -> vector<16x128xf32>
    %6 = vector.extract_strided_slice %1 {offsets = [1, 0], sizes = [16, 128], strides = [1, 1]} : vector<24x128xbf16> to vector<16x128xbf16>
    %c1 = arith.constant 1 : index
    %c0_5 = arith.constant 0 : index
    %c0_6 = arith.constant 0 : index
    %7 = vector.load %arg2[%c1, %c0_5, %c0_6] : memref<3x128x128xbf16, #tpu.memory_space<vmem>>, vector<1x128x128xbf16>
    %8 = vector.shape_cast %7 : vector<1x128x128xbf16> to vector<128x128xbf16>
    %cst_7 = arith.constant dense<0.000000e+00> : vector<16x128xf32>
    %9 = tpu.matmul %6, %8, %cst_7 {dimension_numbers = #tpu.dot_dimension_numbers<[1], [0], [0], [1], [0, 0, 1, 1], [], []>} : vector<16x128xbf16>, vector<128x128xbf16>, vector<16x128xf32> -> vector<16x128xf32>
    %10 = arith.addf %5, %9 : vector<16x128xf32>
    %11 = vector.extract_strided_slice %1 {offsets = [2, 0], sizes = [16, 128], strides = [1, 1]} : vector<24x128xbf16> to vector<16x128xbf16>
    %c2 = arith.constant 2 : index
    %c0_8 = arith.constant 0 : index
    %c0_9 = arith.constant 0 : index
    %12 = vector.load %arg2[%c2, %c0_8, %c0_9] : memref<3x128x128xbf16, #tpu.memory_space<vmem>>, vector<1x128x128xbf16>
    %13 = vector.shape_cast %12 : vector<1x128x128xbf16> to vector<128x128xbf16>
    %cst_10 = arith.constant dense<0.000000e+00> : vector<16x128xf32>
    %14 = tpu.matmul %11, %13, %cst_10 {dimension_numbers = #tpu.dot_dimension_numbers<[1], [0], [0], [1], [0, 0, 1, 1], [], []>} : vector<16x128xbf16>, vector<128x128xbf16>, vector<16x128xf32> -> vector<16x128xf32>
    %15 = arith.addf %10, %14 : vector<16x128xf32>
    %c0_11 = arith.constant 0 : index
    %c0_12 = arith.constant 0 : index
    %16 = vector.load %arg3[%c0_11, %c0_12] : memref<1x128xf32, #tpu.memory_space<vmem>>, vector<1x128xf32>
    %17 = vector.broadcast %16 : vector<1x128xf32> to vector<16x128xf32>
    %18 = arith.addf %15, %17 : vector<16x128xf32>
    %cst_13 = arith.constant 0.000000e+00 : f32
    %19 = vector.broadcast %cst_13 : f32 to vector<16x128xf32>
    %20 = arith.maximumf %18, %19 : vector<16x128xf32>
    %cst_14 = arith.constant 0.000000e+00 : bf16
    %21 = vector.broadcast %cst_14 : bf16 to vector<24x128xbf16>
    %c0_15 = arith.constant 0 : index
    %c0_16 = arith.constant 0 : index
    %22 = vector.load %arg10[%c0_15, %c0_16] : memref<24x128xbf16, #tpu.memory_space<vmem>>, vector<24x128xbf16>
    tpu.vector_store %arg10[%c0_15, %c0_16], %21 {strides = array<i32>} : memref<24x128xbf16, #tpu.memory_space<vmem>>, vector<24x128xbf16>,
    %23 = arith.truncf %20 : vector<16x128xf32> to vector<16x128xbf16>
    %c1_17 = arith.constant 1 : index
    %c0_18 = arith.constant 0 : index
    %24 = vector.load %arg10[%c1_17, %c0_18] : memref<24x128xbf16, #tpu.memory_space<vmem>>, vector<16x128xbf16>
    tpu.vector_store %arg10[%c1_17, %c0_18], %23 {strides = array<i32>} : memref<24x128xbf16, #tpu.memory_space<vmem>>, vector<16x128xbf16>,
    %c0_19 = arith.constant 0 : index
    %c0_20 = arith.constant 0 : index
    %25 = vector.load %arg10[%c0_19, %c0_20] : memref<24x128xbf16, #tpu.memory_space<vmem>>, vector<24x128xbf16>
    %26 = vector.extract_strided_slice %25 {offsets = [0, 0], sizes = [16, 128], strides = [1, 1]} : vector<24x128xbf16> to vector<16x128xbf16>
    %c0_21 = arith.constant 0 : index
    %c0_22 = arith.constant 0 : index
    %c0_23 = arith.constant 0 : index
    %27 = vector.load %arg4[%c0_21, %c0_22, %c0_23] : memref<3x128x128xbf16, #tpu.memory_space<vmem>>, vector<1x128x128xbf16>
    %28 = vector.shape_cast %27 : vector<1x128x128xbf16> to vector<128x128xbf16>
    %cst_24 = arith.constant dense<0.000000e+00> : vector<16x128xf32>
    %29 = tpu.matmul %26, %28, %cst_24 {dimension_numbers = #tpu.dot_dimension_numbers<[1], [0], [0], [1], [0, 0, 1, 1], [], []>} : vector<16x128xbf16>, vector<128x128xbf16>, vector<16x128xf32> -> vector<16x128xf32>
    %30 = vector.extract_strided_slice %25 {offsets = [1, 0], sizes = [16, 128], strides = [1, 1]} : vector<24x128xbf16> to vector<16x128xbf16>
    %c1_25 = arith.constant 1 : index
    %c0_26 = arith.constant 0 : index
    %c0_27 = arith.constant 0 : index
    %31 = vector.load %arg4[%c1_25, %c0_26, %c0_27] : memref<3x128x128xbf16, #tpu.memory_space<vmem>>, vector<1x128x128xbf16>
    %32 = vector.shape_cast %31 : vector<1x128x128xbf16> to vector<128x128xbf16>
    %cst_28 = arith.constant dense<0.000000e+00> : vector<16x128xf32>
    %33 = tpu.matmul %30, %32, %cst_28 {dimension_numbers = #tpu.dot_dimension_numbers<[1], [0], [0], [1], [0, 0, 1, 1], [], []>} : vector<16x128xbf16>, vector<128x128xbf16>, vector<16x128xf32> -> vector<16x128xf32>
    %34 = arith.addf %29, %33 : vector<16x128xf32>
    %35 = vector.extract_strided_slice %25 {offsets = [2, 0], sizes = [16, 128], strides = [1, 1]} : vector<24x128xbf16> to vector<16x128xbf16>
    %c2_29 = arith.constant 2 : index
    %c0_30 = arith.constant 0 : index
    %c0_31 = arith.constant 0 : index
    %36 = vector.load %arg4[%c2_29, %c0_30, %c0_31] : memref<3x128x128xbf16, #tpu.memory_space<vmem>>, vector<1x128x128xbf16>
    %37 = vector.shape_cast %36 : vector<1x128x128xbf16> to vector<128x128xbf16>
    %cst_32 = arith.constant dense<0.000000e+00> : vector<16x128xf32>
    %38 = tpu.matmul %35, %37, %cst_32 {dimension_numbers = #tpu.dot_dimension_numbers<[1], [0], [0], [1], [0, 0, 1, 1], [], []>} : vector<16x128xbf16>, vector<128x128xbf16>, vector<16x128xf32> -> vector<16x128xf32>
    %39 = arith.addf %34, %38 : vector<16x128xf32>
    %c0_33 = arith.constant 0 : index
    %c0_34 = arith.constant 0 : index
    %40 = vector.load %arg5[%c0_33, %c0_34] : memref<1x128xf32, #tpu.memory_space<vmem>>, vector<1x128xf32>
    %41 = vector.broadcast %40 : vector<1x128xf32> to vector<16x128xf32>
    %42 = arith.addf %39, %41 : vector<16x128xf32>
    %cst_35 = arith.constant 0.000000e+00 : f32
    %43 = vector.broadcast %cst_35 : f32 to vector<16x128xf32>
    %44 = arith.maximumf %42, %43 : vector<16x128xf32>
    %c0_36 = arith.constant 0 : index
    %c0_37 = arith.constant 0 : index
    %c0_38 = arith.constant 0 : index
    %45 = vector.load %arg8[%c0_36, %c0_37, %c0_38] : memref<1x16x128xf32, #tpu.memory_space<vmem>>, vector<1x16x128xf32>
    %46 = vector.shape_cast %45 : vector<1x16x128xf32> to vector<16x128xf32>
    %47 = vector.shape_cast %44 : vector<16x128xf32> to vector<1x16x128xf32>
    tpu.vector_store %arg8[%c0_36, %c0_37, %c0_38], %47 {strides = array<i32>} : memref<1x16x128xf32, #tpu.memory_space<vmem>>, vector<1x16x128xf32>,
    %cst_39 = arith.constant 0.000000e+00 : bf16
    %48 = vector.broadcast %cst_39 : bf16 to vector<24x128xbf16>
    %c0_40 = arith.constant 0 : index
    %c0_41 = arith.constant 0 : index
    %49 = vector.load %arg11[%c0_40, %c0_41] : memref<24x128xbf16, #tpu.memory_space<vmem>>, vector<24x128xbf16>
    tpu.vector_store %arg11[%c0_40, %c0_41], %48 {strides = array<i32>} : memref<24x128xbf16, #tpu.memory_space<vmem>>, vector<24x128xbf16>,
    %50 = arith.truncf %44 : vector<16x128xf32> to vector<16x128xbf16>
    %c1_42 = arith.constant 1 : index
    %c0_43 = arith.constant 0 : index
    %51 = vector.load %arg11[%c1_42, %c0_43] : memref<24x128xbf16, #tpu.memory_space<vmem>>, vector<16x128xbf16>
    tpu.vector_store %arg11[%c1_42, %c0_43], %50 {strides = array<i32>} : memref<24x128xbf16, #tpu.memory_space<vmem>>, vector<16x128xbf16>,
    %c0_44 = arith.constant 0 : index
    %c0_45 = arith.constant 0 : index
    %52 = vector.load %arg11[%c0_44, %c0_45] : memref<24x128xbf16, #tpu.memory_space<vmem>>, vector<24x128xbf16>
    %c0_46 = arith.constant 0 : index
    %c0_47 = arith.constant 0 : index
    %53 = vector.load %arg7[%c0_46, %c0_47] : memref<24x24xbf16, #tpu.memory_space<vmem>>, vector<24x24xbf16>
    %cst_48 = arith.constant dense<0.000000e+00> : vector<24x128xf32>
    %54 = tpu.matmul %53, %52, %cst_48 {dimension_numbers = #tpu.dot_dimension_numbers<[1], [0], [0], [1], [0, 0, 1, 1], [], []>} : vector<24x24xbf16>, vector<24x128xbf16>, vector<24x128xf32> -> vector<24x128xf32>
    %55 = arith.truncf %54 : vector<24x128xf32> to vector<24x128xbf16>
    %56 = vector.extract_strided_slice %55 {offsets = [0, 0], sizes = [8, 128], strides = [1, 1]} : vector<24x128xbf16> to vector<8x128xbf16>
    %c0_49 = arith.constant 0 : index
    %c0_50 = arith.constant 0 : index
    %c0_51 = arith.constant 0 : index
    %57 = vector.load %arg6[%c0_49, %c0_50, %c0_51] : memref<3x128x128xbf16, #tpu.memory_space<vmem>>, vector<1x128x128xbf16>
    %58 = vector.shape_cast %57 : vector<1x128x128xbf16> to vector<128x128xbf16>
    %cst_52 = arith.constant dense<0.000000e+00> : vector<8x128xf32>
    %59 = tpu.matmul %56, %58, %cst_52 {dimension_numbers = #tpu.dot_dimension_numbers<[1], [0], [0], [1], [0, 0, 1, 1], [], []>} : vector<8x128xbf16>, vector<128x128xbf16>, vector<8x128xf32> -> vector<8x128xf32>
    %60 = vector.extract_strided_slice %55 {offsets = [8, 0], sizes = [8, 128], strides = [1, 1]} : vector<24x128xbf16> to vector<8x128xbf16>
    %c1_53 = arith.constant 1 : index
    %c0_54 = arith.constant 0 : index
    %c0_55 = arith.constant 0 : index
    %61 = vector.load %arg6[%c1_53, %c0_54, %c0_55] : memref<3x128x128xbf16, #tpu.memory_space<vmem>>, vector<1x128x128xbf16>
    %62 = vector.shape_cast %61 : vector<1x128x128xbf16> to vector<128x128xbf16>
    %cst_56 = arith.constant dense<0.000000e+00> : vector<8x128xf32>
    %63 = tpu.matmul %60, %62, %cst_56 {dimension_numbers = #tpu.dot_dimension_numbers<[1], [0], [0], [1], [0, 0, 1, 1], [], []>} : vector<8x128xbf16>, vector<128x128xbf16>, vector<8x128xf32> -> vector<8x128xf32>
    %64 = arith.addf %59, %63 : vector<8x128xf32>
    %65 = vector.extract_strided_slice %55 {offsets = [16, 0], sizes = [8, 128], strides = [1, 1]} : vector<24x128xbf16> to vector<8x128xbf16>
    %c2_57 = arith.constant 2 : index
    %c0_58 = arith.constant 0 : index
    %c0_59 = arith.constant 0 : index
    %66 = vector.load %arg6[%c2_57, %c0_58, %c0_59] : memref<3x128x128xbf16, #tpu.memory_space<vmem>>, vector<1x128x128xbf16>
    %67 = vector.shape_cast %66 : vector<1x128x128xbf16> to vector<128x128xbf16>
    %cst_60 = arith.constant dense<0.000000e+00> : vector<8x128xf32>
    %68 = tpu.matmul %65, %67, %cst_60 {dimension_numbers = #tpu.dot_dimension_numbers<[1], [0], [0], [1], [0, 0, 1, 1], [], []>} : vector<8x128xbf16>, vector<128x128xbf16>, vector<8x128xf32> -> vector<8x128xf32>
    %69 = arith.addf %64, %68 : vector<8x128xf32>
    %c0_61 = arith.constant 0 : index
    %c0_62 = arith.constant 0 : index
    %c0_63 = arith.constant 0 : index
    %70 = vector.load %arg9[%c0_61, %c0_62, %c0_63] : memref<1x8x128xf32, #tpu.memory_space<vmem>>, vector<1x8x128xf32>
    %71 = vector.shape_cast %70 : vector<1x8x128xf32> to vector<8x128xf32>
    %72 = vector.shape_cast %69 : vector<8x128xf32> to vector<1x8x128xf32>
    tpu.vector_store %arg9[%c0_61, %c0_62, %c0_63], %72 {strides = array<i32>} : memref<1x8x128xf32, #tpu.memory_space<vmem>>, vector<1x8x128xf32>,
    return
  }
  func.func @transform_0(%arg0: i32) -> (i32, i32, i32) {
    %c0_i32 = arith.constant 0 : i32
    %c0_i32_0 = arith.constant 0 : i32
    %c0_i32_1 = arith.constant 0 : i32
    return %arg0, %c0_i32, %c0_i32_0 : i32, i32, i32
  }
  func.func @transform_1(%arg0: i32) -> (i32, i32, i32) {
    %c0_i32 = arith.constant 0 : i32
    %c0_i32_0 = arith.constant 0 : i32
    %c0_i32_1 = arith.constant 0 : i32
    %c0_i32_2 = arith.constant 0 : i32
    return %c0_i32, %c0_i32_0, %c0_i32_1 : i32, i32, i32
  }
  func.func @transform_2(%arg0: i32) -> (i32, i32) {
    %c0_i32 = arith.constant 0 : i32
    %c0_i32_0 = arith.constant 0 : i32
    %c0_i32_1 = arith.constant 0 : i32
    return %c0_i32, %c0_i32_0 : i32, i32
  }
  func.func @transform_3(%arg0: i32) -> (i32, i32, i32) {
    %c0_i32 = arith.constant 0 : i32
    %c0_i32_0 = arith.constant 0 : i32
    %c0_i32_1 = arith.constant 0 : i32
    %c0_i32_2 = arith.constant 0 : i32
    return %c0_i32, %c0_i32_0, %c0_i32_1 : i32, i32, i32
  }
  func.func @transform_4(%arg0: i32) -> (i32, i32) {
    %c0_i32 = arith.constant 0 : i32
    %c0_i32_0 = arith.constant 0 : i32
    %c0_i32_1 = arith.constant 0 : i32
    return %c0_i32, %c0_i32_0 : i32, i32
  }
  func.func @transform_5(%arg0: i32) -> (i32, i32, i32) {
    %c0_i32 = arith.constant 0 : i32
    %c0_i32_0 = arith.constant 0 : i32
    %c0_i32_1 = arith.constant 0 : i32
    %c0_i32_2 = arith.constant 0 : i32
    return %c0_i32, %c0_i32_0, %c0_i32_1 : i32, i32, i32
  }
  func.func @transform_6(%arg0: i32) -> (i32, i32) {
    %c0_i32 = arith.constant 0 : i32
    %c0_i32_0 = arith.constant 0 : i32
    %c0_i32_1 = arith.constant 0 : i32
    return %c0_i32, %c0_i32_0 : i32, i32
  }
  func.func @transform_7(%arg0: i32) -> (i32, i32, i32) {
    %c0_i32 = arith.constant 0 : i32
    %c0_i32_0 = arith.constant 0 : i32
    %c0_i32_1 = arith.constant 0 : i32
    return %arg0, %c0_i32, %c0_i32_0 : i32, i32, i32
  }
  func.func @transform_8(%arg0: i32) -> (i32, i32, i32) {
    %c0_i32 = arith.constant 0 : i32
    %c0_i32_0 = arith.constant 0 : i32
    %c0_i32_1 = arith.constant 0 : i32
    return %arg0, %c0_i32, %c0_i32_0 : i32, i32, i32
  }
}

</mosaic_0001>

<bundles_post_ra>
// kernel: tile.13
= control target key start
LH: loop header
LB: loop body
LE: loop exit
PB: predicated region body
PF: predicated region fallthrough
CT: control target
= control target key end

     0   :  { %s28_s0 = inlined_call_operand.vmem [shape: f32[8], index: 0, kind: input, shape index: {}]   ;;  %s29_s1 = inlined_call_operand.vmem [shape: f32[16,8], index: 1, kind: output, shape index: {}]  }
   0x1   :  { %v4_v0 = vld [vmem:[%s28_s0] ss:$0 sm:$0xff] }
   0x2   :  { %5 = vst [vmem:[%s29_s1] sm:$0xff] %v4_v0  ;;  %8 = vst [vmem:[%s29_s1 + $0x8] sm:$0xff] %v4_v0 }

// kernel: tile.14
= control target key start
LH: loop header
LB: loop body
LE: loop exit
PB: predicated region body
PF: predicated region fallthrough
CT: control target
= control target key end

     0   :  { %s131_s10 = smov 120   ;;  %s132_s11 = smov 104   ;;  %vm3_vm0 = vcmask 64512   ;;  %vm9_vm1 = vcmask 1048512   ;;  %vm15_vm2 = vcmask 982912   ;;  %vm21_vm3 = vcmask 917312   ;;  %s207_s0 = inlined_call_operand.vmem [shape: f32[16,8], index: 0, kind: input, shape index: {}]   ;;  %s208_s1 = inlined_call_operand.vmem [shape: f32[1,128], index: 1, kind: output, shape index: {}]  }
   0x1   :  { %v101_v0 = vld [vmem:[%s207_s0 + $0xf] sm:$0x1]   ;;  %v103_v1 = vld [vmem:[%s207_s0 + $0xd] sm:$0x1]   ;;  %v102_v2 = vld [vmem:[%s207_s0 + $0xe] sm:$0x1]  }
   0x2   :  { %7 = vrot.lane.b32.xlu0 %v101_v0, %s131_s10  ;;  %19 = vrot.lane.b32.xlu1 %v103_v1, %s132_s11  ;;  %v104_v3 = vld [vmem:[%s207_s0 + $0xc] sm:$0x1]   ;;  %s133_s16 = smov 112   ;;  %s134_s17 = smov 96   ;;  %v105_v4 = vld [vmem:[%s207_s0 + $0xb] sm:$0x1]  }
   0x3   :  { %v106_v5 = vld [vmem:[%s207_s0 + $0xa] sm:$0x1]   ;;  %v2_v6 = vld [vmem:[%s207_s0] sm:$0x1]   ;;  %s135_s24 = smov 88   ;;  %s136_s25 = smov 80  }
   0x4   :  { %4 = vst.msk [vmem:[#allocation0] sm:$0x1] %vm3_vm0, %v2_v6   ;;  %v107_v7 = vld [vmem:[%s207_s0 + $0x9] sm:$0x1]   ;;  %v108_v8 = vld [vmem:[%s207_s0 + $0x8] sm:$0x1]  }
   0x5   :  { %s137_s30 = smov 72   ;;  %s138_s2 = smov 64   ;;  %v109_v9 = vld [vmem:[%s207_s0 + $0x7] sm:$0x1]   ;;  %v110_v10 = vld [vmem:[%s207_s0 + $0x6] sm:$0x1]  }
   0x6   :  { %13 = vrot.lane.b32.xlu0 %v102_v2, %s133_s16  ;;  %25 = vrot.lane.b32.xlu1 %v104_v3, %s134_s17  ;;  %s139_s7 = smov 56   ;;  %s140_s8 = smov 48   ;;  %v111_v11 = vld [vmem:[%s207_s0 + $0x5] sm:$0x1]   ;;  %v112_v12 = vld [vmem:[%s207_s0 + $0x4] sm:$0x1]  }
   0x7   :  { %s141_s13 = smov 40   ;;  %s142_s14 = smov 32   ;;  %v113_v13 = vld [vmem:[%s207_s0 + $0x3] sm:$0x1]   ;;  %v114_v14 = vld [vmem:[%s207_s0 + $0x2] sm:$0x1]  }
   0x8   :  { %s143_s19 = smov 24   ;;  %s144_s20 = smov 16   ;;  %v115_v15 = vld [vmem:[%s207_s0 + $0x1] sm:$0x1]   ;;  %vm27_vm4 = vcmask 851712   ;;  %vm33_vm5 = vcmask 786112  }
   0x9   :  { %s145_s0 = smov 8   ;;  %vm39_vm6 = vcmask 720512   ;;  %vm45_vm7 = vcmask 654912   ;;  %vm51_vm8 = vcmask 589312   ;;  %vm57_vm9 = vcmask 523712  }
   0xa   :  { %31 = vrot.lane.b32.xlu0 %v105_v4, %s135_s24  ;;  %37 = vrot.lane.b32.xlu1 %v106_v5, %s136_s25  ;;  %vm63_vm10 = vcmask 458112   ;;  %vm69_vm11 = vcmask 392512   ;;  %vm75_vm12 = vcmask 326912   ;;  %vm81_vm13 = vcmask 261312  }
   0xb   :  { %vm87_vm14 = vcmask 195712   ;;  %vm93_vm15 = vcmask 130112  }
   0xe   :  { %43 = vrot.lane.b32.xlu0 %v107_v7, %s137_s30  ;;  %49 = vrot.lane.b32.xlu1 %v108_v8, %s138_s2 }
  0x12   :  { %55 = vrot.lane.b32.xlu0 %v109_v9, %s139_s7  ;;  %61 = vrot.lane.b32.xlu1 %v110_v10, %s140_s8 }
  0x16   :  { %67 = vrot.lane.b32.xlu0 %v111_v11, %s141_s13  ;;  %73 = vrot.lane.b32.xlu1 %v112_v12, %s142_s14 }
  0x1a   :  { %79 = vrot.lane.b32.xlu0 %v113_v13, %s143_s19  ;;  %85 = vrot.lane.b32.xlu1 %v114_v14, %s144_s20 }
  0x1e   :  { %91 = vrot.lane.b32.xlu0 %v115_v15, %s145_s0 }
  0x74   :  { %v8_v16 = vpop.permute.xlu0 %7   ;;  %v20_v17 = vpop.permute.xlu1 %19  }
  0x75   :  { %10 = vst.msk [vmem:[#allocation0] sm:$0x1] %vm9_vm1, %v8_v16  }
  0x78   :  { %v14_v18 = vpop.permute.xlu0 %13   ;;  %v26_v19 = vpop.permute.xlu1 %25  }
  0x79   :  { %16 = vst.msk [vmem:[#allocation0] sm:$0x1] %vm15_vm2, %v14_v18  }
  0x7a   :  { %22 = vst.msk [vmem:[#allocation0] sm:$0x1] %vm21_vm3, %v20_v17  }
  0x7b   :  { %28 = vst.msk [vmem:[#allocation0] sm:$0x1] %vm27_vm4, %v26_v19  }
  0x7c   :  { %v32_v20 = vpop.permute.xlu0 %31   ;;  %v38_v21 = vpop.permute.xlu1 %37  }
  0x7d   :  { %34 = vst.msk [vmem:[#allocation0] sm:$0x1] %vm33_vm5, %v32_v20  }
  0x7e   :  { %40 = vst.msk [vmem:[#allocation0] sm:$0x1] %vm39_vm6, %v38_v21  }
  0x80   :  { %v44_v22 = vpop.permute.xlu0 %43   ;;  %v50_v23 = vpop.permute.xlu1 %49  }
  0x81   :  { %46 = vst.msk [vmem:[#allocation0] sm:$0x1] %vm45_vm7, %v44_v22  }
  0x82   :  { %52 = vst.msk [vmem:[#allocation0] sm:$0x1] %vm51_vm8, %v50_v23  }
  0x84   :  { %v56_v24 = vpop.permute.xlu0 %55   ;;  %v62_v25 = vpop.permute.xlu1 %61  }
  0x85   :  { %58 = vst.msk [vmem:[#allocation0] sm:$0x1] %vm57_vm9, %v56_v24  }
  0x86   :  { %64 = vst.msk [vmem:[#allocation0] sm:$0x1] %vm63_vm10, %v62_v25  }
  0x88   :  { %v68_v26 = vpop.permute.xlu0 %67   ;;  %v74_v27 = vpop.permute.xlu1 %73  }
  0x89   :  { %70 = vst.msk [vmem:[#allocation0] sm:$0x1] %vm69_vm11, %v68_v26  }
  0x8a   :  { %76 = vst.msk [vmem:[#allocation0] sm:$0x1] %vm75_vm12, %v74_v27  }
  0x8c   :  { %v80_v28 = vpop.permute.xlu0 %79   ;;  %v86_v29 = vpop.permute.xlu1 %85  }
  0x8d   :  { %82 = vst.msk [vmem:[#allocation0] sm:$0x1] %vm81_vm13, %v80_v28  }
  0x8e   :  { %88 = vst.msk [vmem:[#allocation0] sm:$0x1] %vm87_vm14, %v86_v29  }
  0x90   :  { %v92_v30 = vpop.permute.xlu0 %91  }
  0x91   :  { %94 = vst.msk [vmem:[#allocation0] sm:$0x1] %vm93_vm15, %v92_v30  }
  0x98   :  { %v98_v31 = vld [vmem:[#allocation0] sm:$0x1] }
  0x99   :  { %100 = vst [vmem:[%s208_s1] sm:$0x1] %v98_v31 }

// kernel: down_forward.1
= control target key start
LH: loop header
LB: loop body
LE: loop exit
PB: predicated region body
PF: predicated region fallthrough
CT: control target
= control target key end

     0   :  { %s2239_s27 = smov 0   ;;  %s2618_s0 = inlined_call_operand.vmem [shape: bf16[2,24,128], index: 0, kind: input, shape index: {}]   ;;  %s2619_s1 = inlined_call_operand.vmem [shape: bf16[3,128,128], index: 1, kind: input, shape index: {}]   ;;  %s2620_s2 = inlined_call_operand.vmem [shape: f32[1,128], index: 2, kind: input, shape index: {}]   ;;  %s2621_s3 = inlined_call_operand.vmem [shape: bf16[3,128,128], index: 3, kind: input, shape index: {}]   ;;  %s2622_s4 = inlined_call_operand.vmem [shape: f32[1,128], index: 4, kind: input, shape index: {}]   ;;  %s2623_s5 = inlined_call_operand.vmem [shape: bf16[3,128,128], index: 5, kind: input, shape index: {}]   ;;  %s2624_s6 = inlined_call_operand.vmem [shape: bf16[24,24], index: 6, kind: input, shape index: {}]   ;;  %s2625_s7 = inlined_call_operand.vmem [shape: f32[2,16,128], index: 7, kind: output, shape index: {0}]   ;;  %s2626_s8 = inlined_call_operand.vmem [shape: f32[2,8,128], index: 8, kind: output, shape index: {1}]  }
   0x1 LB: > { %s1609_s28 = sadd.s32 4294967295, %s2189_s27   ;;  %p1613_p0 = scmp.ge.s32.totalorder %s2189_s27, 1  ;;  %s2189_s27 = sphi %s2239_s27, %s19_s27  }
   0x2   : > { %p265_p1 = scmp.lt.s32.totalorder %s2189_s27, 3 }
   0x4   : > { %p266_p2 = pnand %p1613_p0, %p265_p1 }
   0x5   : > { %v2103_v0 = vld [vmem:[%s2619_s1 + $0x40] sm:$0xff] (!%p266_p2)   ;;  %v2191_v1 = vmov (!%p266_p2), 0.0   ;;  %v2104_v2 = vld [vmem:[%s2619_s1 + $0x48] sm:$0xff] (!%p266_p2)   ;;  %vm2192_vm0 = vmmov (!%p266_p2), 0   ;;  %p303_p3 = scmp.lt.s32.totalorder (!%p266_p2), %s1609_s28, 1  ;;  %v2105_v3 = vld [vmem:[%s2619_s1 + $0x50] sm:$0xff] (!%p266_p2)  }
   0x6   : > { %269 = sbr.rel (%p266_p2) target bundleno = 1121 (0x461), region = 48  ;;  %1894 = vmatprep.subr.bf16.mxu0 (!%p266_p2), %v2191_v1  ;;  %1954 = vmatprep.subr.bf16.mxu1 (!%p266_p2), %v2191_v1  ;;  %v2106_v4 = vld [vmem:[%s2619_s1 + $0x58] sm:$0xff] (!%p266_p2)   ;;  %v2107_v5 = vld [vmem:[%s2619_s1 + $0x60] sm:$0xff] (!%p266_p2)   ;;  %vm572_vm1 = vcmask (!%p266_p2), 1046528   ;;  %v2108_v10 = vld [vmem:[%s2619_s1 + $0x68] sm:$0xff] (!%p266_p2)   ;;  %v2193_v42 = vmov (!%p266_p2), 0  }
   0x7   : > { %1895 = vmatpush3.bf16.msra.mxu0 (!%p266_p2), %v2103_v0  ;;  %1910 = vmatprep.mubr.msk.bf16.mxu0 (!%p266_p2), %vm2192_vm0, %v2191_v1  ;;  %v2109_v13 = vld [vmem:[%s2619_s1 + $0x70] sm:$0xff] (!%p266_p2)   ;;  %vm362_vm2 = vsmask.f32 (!%p266_p2), 7424  ;;  %v2110_v17 = vld [vmem:[%s2619_s1 + $0x78] sm:$0xff] (!%p266_p2)   ;;  %v2113_v20 = vld [vmem:[%s2619_s1] sm:$0xff] (!%p266_p2)   ;;  %vm711_vm3 = vcmask (!%p266_p2), 1043456  }
   0x8   : > { %1896 = vmatprep.subr.bf16.mxu0 (!%p266_p2), %v2191_v1  ;;  %1970 = vmatprep.mubr.msk.bf16.mxu1 (!%p266_p2), %vm2192_vm0, %v2191_v1  ;;  %v2114_v22 = vld [vmem:[%s2619_s1 + $0x8] sm:$0xff] (!%p266_p2)   ;;  %v2115_v23 = vld [vmem:[%s2619_s1 + $0x10] sm:$0xff] (!%p266_p2)   ;;  %v2116_v24 = vld [vmem:[%s2619_s1 + $0x18] sm:$0xff] (!%p266_p2)   ;;  %679 = vst [vmem:[#allocation2] sm:$0xf] (!%p266_p2), %v2193_v42  ;;  %vm718_vm7 = vcmask (!%p266_p2), 1040384  }
   0x9   : > { %v2117_v25 = vld [vmem:[%s2619_s1 + $0x20] sm:$0xff] (!%p266_p2)   ;;  %v2118_v26 = vld [vmem:[%s2619_s1 + $0x28] sm:$0xff] (!%p266_p2)   ;;  %v2119_v27 = vld [vmem:[%s2619_s1 + $0x30] sm:$0xff] (!%p266_p2)   ;;  %680 = vst [vmem:[#allocation2 + $0x4] sm:$0xf] (!%p266_p2), %v2193_v42  ;;  %vm1143_vm11 = vcmask (!%p266_p2), 195584  }
   0xa   : > { %v2120_v28 = vld [vmem:[%s2619_s1 + $0x38] sm:$0xff] (!%p266_p2)   ;;  %v2121_v29 = vld [vmem:[%s2619_s1 + $0x80] sm:$0xff] (!%p266_p2)   ;;  %v2122_v30 = vld [vmem:[%s2619_s1 + $0x88] sm:$0xff] (!%p266_p2)   ;;  %681 = vst [vmem:[#allocation2 + $0x8] sm:$0xf] (!%p266_p2), %v2193_v42 }
   0xb   : > { %1897 = vmatpush3.bf16.msra.mxu0 (!%p266_p2), %v2104_v2  ;;  %v2123_v31 = vld [vmem:[%s2619_s1 + $0x90] sm:$0xff] (!%p266_p2)   ;;  %v2124_v32 = vld [vmem:[%s2619_s1 + $0x98] sm:$0xff] (!%p266_p2)   ;;  %v2125_v33 = vld [vmem:[%s2619_s1 + $0xa0] sm:$0xff] (!%p266_p2)   ;;  %1084 = vst [vmem:[#allocation3] sm:$0xf] (!%p266_p2), %v2193_v42 }
   0xc   : > { %1898 = vmatprep.subr.bf16.mxu0 (!%p266_p2), %v2191_v1  ;;  %v2126_v34 = vld [vmem:[%s2619_s1 + $0xa8] sm:$0xff] (!%p266_p2)   ;;  %v2127_v35 = vld [vmem:[%s2619_s1 + $0xb0] sm:$0xff] (!%p266_p2)   ;;  %v2128_v36 = vld [vmem:[%s2619_s1 + $0xb8] sm:$0xff] (!%p266_p2)   ;;  %1085 = vst [vmem:[#allocation3 + $0x4] sm:$0xf] (!%p266_p2), %v2193_v42 }
   0xd   : > { %s2634_s28 = smov (!%p303_p3, %s1609_s28), 1  ;;  %v2129_v37 = vld [vmem:[%s2621_s3] sm:$0xff]   ;;  %v2130_v38 = vld [vmem:[%s2621_s3 + $0x8] sm:$0xff]   ;;  %v2132_v40 = vld [vmem:[%s2621_s3 + $0x10] sm:$0xff]   ;;  %1086 = vst [vmem:[#allocation3 + $0x8] sm:$0xf] %v2193_v42 }
   0xe   : > { %s2091_s13 = smul.u32 12, %s2634_s28  ;;  %v2131_v39 = vld [vmem:[%s2621_s3 + $0x40] sm:$0xff]   ;;  %v2133_v41 = vld [vmem:[%s2621_s3 + $0x48] sm:$0xff]   ;;  %v2134_v43 = vld [vmem:[%s2621_s3 + $0x18] sm:$0xff]   ;;  %vm712_vm4 = vsmask.f32 7938 }
   0xf   : > { %1899 = vmatpush3.bf16.msra.mxu0 %v2105_v3  ;;  %1955 = vmatpush3.bf16.msra.mxu1 %v2131_v39  ;;  %v2135_v44 = vld [vmem:[%s2621_s3 + $0x50] sm:$0xff]   ;;  %v2136_v45 = vld [vmem:[%s2621_s3 + $0x20] sm:$0xff]   ;;  %v2137_v46 = vld [vmem:[%s2621_s3 + $0x58] sm:$0xff]   ;;  %vm688_vm5 = vsmask.f32 256  ;;  %s1804_s25 = sshll.u32 %s2634_s28, 4 }
  0x10   : > { %s307_s16 = scalar_lea.vmem %s2618_s0, %s2091_s13  ;;  %1900 = vmatprep.subr.bf16.mxu0 %v2191_v1  ;;  %1956 = vmatprep.subr.bf16.mxu1 %v2191_v1  ;;  %v2138_v47 = vld [vmem:[%s2621_s3 + $0x28] sm:$0xff]   ;;  %v2139_v48 = vld [vmem:[%s2621_s3 + $0x60] sm:$0xff]   ;;  %v2140_v49 = vld [vmem:[%s2621_s3 + $0x30] sm:$0xff]   ;;  %vm689_vm6 = vsmask.f32 4368  ;;  %s312_s30 = scalar_lea.vmem %s2625_s7, %s1804_s25 }
  0x11   : > { %v2111_v6 = vld [vmem:[%s307_s16] sm:$0xff]   ;;  %v2112_v7 = vld [vmem:[%s307_s16 + $0x8] ss:$0 sps:$4 sm:$0xff]   ;;  %v2142_v51 = vld [vmem:[%s2621_s3 + $0x38] sm:$0xff]   ;;  %s1617_s29 = sshll.u32 %s2634_s28, 3 }
  0x12   : > { %v573_v8 = vrot.slane %v2111_v6, 1  ;;  %v574_v9 = vrot.slane %v2112_v7, 1  ;;  %v366_v11 = vshll.u32 %v2111_v6, 16  ;;  %v364_v14 = vshrl.u32 %v2111_v6, 16  ;;  %v2141_v50 = vld [vmem:[%s2621_s3 + $0x68] sm:$0xff]   ;;  %v2143_v52 = vld [vmem:[%s2621_s3 + $0x70] sm:$0xff]   ;;  %vm2433_vm8 = vmand %vm711_vm3, %vm712_vm4  ;;  %s316_s10 = scalar_lea.vmem %s2626_s8, %s1617_s29 }
  0x13   : > { %1901 = vmatpush3.bf16.msra.mxu0 %v2106_v4  ;;  %v371_v16 = vshll.u32 %v2112_v7, 16  ;;  %1957 = vmatpush3.bf16.msra.mxu1 %v2133_v41  ;;  %v2145_v53 = vld [vmem:[%s2621_s3 + $0x78] sm:$0xff]   ;;  %v1676_v2 = vld [vmem:[%s2620_s2] ss:$0 sm:$0xff]  ;;  %vm2437_vm9 = vmor %vm688_vm5, %vm689_vm6 }
  0x14   : > { %1902 = vmatprep.subr.bf16.mxu0 %v2191_v1  ;;  %v2283_v12 = vsel %vm572_vm1, %v573_v8, %v574_v9  ;;  %v368_v15 = vrot.slane %v366_v11, 1  ;;  %1958 = vmatprep.subr.bf16.mxu1 %v2191_v1  ;;  %vm2441_vm10 = vmand %vm718_vm7, %vm688_vm5  ;;  %v2148_v42 = vld [vmem:[%s2621_s3 + $0x88] sm:$0xff]  }
  0x15   : > { %v373_v19 = vrot.slane %v371_v16, 1 }
  0x16   : > { %v369_v18 = vor.u32 %v368_v15, %v364_v14 }
  0x17   : > { %1903 = vmatpush3.bf16.msra.mxu0 %v2107_v5  ;;  %1959 = vmatpush3.bf16.msra.mxu1 %v2135_v44  ;;  %v2150_v44 = vld [vmem:[%s2621_s3 + $0x98] sm:$0xff]  }
  0x18   : > { %1904 = vmatprep.subr.bf16.mxu0 %v2191_v1  ;;  %v374_v21 = vsel %vm362_vm2, %v369_v18, %v373_v19  ;;  %1960 = vmatprep.subr.bf16.mxu1 %v2191_v1  ;;  %v714_v19 = vld [vmem:[#allocation2] sm:$0xf] }
  0x1b   : > { %1905 = vmatpush3.bf16.msra.mxu0 %v2108_v10  ;;  %1961 = vmatpush3.bf16.msra.mxu1 %v2137_v46  ;;  %v2152_v46 = vld [vmem:[%s2621_s3 + $0xa8] sm:$0xff]  }
  0x1c   : > { %1906 = vmatprep.subr.bf16.mxu0 %v2191_v1  ;;  %1962 = vmatprep.subr.bf16.mxu1 %v2191_v1 }
  0x1f   : > { %1907 = vmatpush3.bf16.msra.mxu0 %v2109_v13  ;;  %1963 = vmatpush3.bf16.msra.mxu1 %v2139_v48  ;;  %v2154_v48 = vld [vmem:[%s2621_s3 + $0xb8] sm:$0xff]  }
  0x20   : > { %1908 = vmatprep.subr.bf16.mxu0 %v2191_v1  ;;  %1964 = vmatprep.subr.bf16.mxu1 %v2191_v1 }
  0x23   : > { %1909 = vmatpush3.bf16.msra.mxu0 %v2110_v17  ;;  %1965 = vmatpush3.bf16.msra.mxu1 %v2141_v50 }
  0x24   : > { %1914 = vmatprep.subr.bf16.mxu0 %v2191_v1  ;;  %1966 = vmatprep.subr.bf16.mxu1 %v2191_v1 }
  0x26   : > { %1911 = vmatmul.mubr.bf16.vlgmr.msra.gmra.mrb[0].mxu0 %v374_v21  ;;  %v2165_v21 = vld [vmem:[%s2623_s5 + $0x70] sm:$0xff]  }
  0x27   : > { %1915 = vmatpush3.bf16.msra.mxu0 %v2113_v20  ;;  %1930 = vmatprep.mubr.msk.bf16.mxu0 %vm2192_vm0, %v2191_v1 }
  0x28   : > { %1916 = vmatprep.subr.bf16.mxu0 %v2191_v1  ;;  %1967 = vmatpush3.bf16.msra.mxu1 %v2143_v52  ;;  %v2157_v52 = vld [vmem:[%s2624_s6] sm:$0xff]  }
  0x29   : > { %1968 = vmatprep.subr.bf16.mxu1 %v2191_v1 }
  0x2b   : > { %1917 = vmatpush3.bf16.msra.mxu0 %v2114_v22 }
  0x2c   : > { %1918 = vmatprep.subr.bf16.mxu0 %v2191_v1  ;;  %1969 = vmatpush3.bf16.msra.mxu1 %v2145_v53  ;;  %v2159_v53 = vld [vmem:[%s2623_s5 + $0x40] sm:$0xff]  }
  0x2d   : > { %1994 = vmatprep.subr.bf16.mxu1 %v2191_v1 }
  0x2f   : > { %1919 = vmatpush3.bf16.msra.mxu0 %v2115_v23 }
  0x30   : > { %1920 = vmatprep.subr.bf16.mxu0 %v2191_v1 }
  0x33   : > { %1921 = vmatpush3.bf16.msra.mxu0 %v2116_v24  ;;  %v2166_v24 = vld [vmem:[%s2623_s5 + $0x78] sm:$0xff]  }
  0x34   : > { %1922 = vmatprep.subr.bf16.mxu0 %v2191_v1 }
  0x37   : > { %1923 = vmatpush3.bf16.msra.mxu0 %v2117_v25  ;;  %v720_v25 = vld [vmem:[#allocation2 + $0x8] sm:$0x1] }
  0x38   : > { %1924 = vmatprep.subr.bf16.mxu0 %v2191_v1 }
  0x3b   : > { %1925 = vmatpush3.bf16.msra.mxu0 %v2118_v26 }
  0x3c   : > { %1926 = vmatprep.subr.bf16.mxu0 %v2191_v1 }
  0x3f   : > { %1927 = vmatpush3.bf16.msra.mxu0 %v2119_v27 }
  0x40   : > { %1928 = vmatprep.subr.bf16.mxu0 %v2191_v1 }
  0x43   : > { %1929 = vmatpush3.bf16.msra.mxu0 %v2120_v28 }
  0x44   : > { %1934 = vmatprep.subr.bf16.mxu0 %v2191_v1 }
  0x46   : > { %1931 = vmatmul.mubr.bf16.vlgmr.msra.gmra.mrb[4].mxu0 %v2111_v6 }
  0x47   : > { %1935 = vmatpush3.bf16.msra.mxu0 %v2121_v29  ;;  %1950 = vmatprep.mubr.msk.bf16.mxu0 %vm2192_vm0, %v2191_v1 }
  0x48   : > { %1936 = vmatprep.subr.bf16.mxu0 %v2191_v1 }
  0x4b   : > { %1937 = vmatpush3.bf16.msra.mxu0 %v2122_v30 }
  0x4c   : > { %1938 = vmatprep.subr.bf16.mxu0 %v2191_v1 }
  0x4f   : > { %1939 = vmatpush3.bf16.msra.mxu0 %v2123_v31 }
  0x50   : > { %1940 = vmatprep.subr.bf16.mxu0 %v2191_v1 }
  0x53   : > { %1941 = vmatpush3.bf16.msra.mxu0 %v2124_v32 }
  0x54   : > { %1942 = vmatprep.subr.bf16.mxu0 %v2191_v1 }
  0x57   : > { %1943 = vmatpush3.bf16.msra.mxu0 %v2125_v33 }
  0x58   : > { %1944 = vmatprep.subr.bf16.mxu0 %v2191_v1 }
  0x5b   : > { %1945 = vmatpush3.bf16.msra.mxu0 %v2126_v34 }
  0x5c   : > { %1946 = vmatprep.subr.bf16.mxu0 %v2191_v1 }
  0x5f   : > { %1947 = vmatpush3.bf16.msra.mxu0 %v2127_v35 }
  0x60   : > { %1948 = vmatprep.subr.bf16.mxu0 %v2191_v1 }
  0x63   : > { %1949 = vmatpush3.bf16.msra.mxu0 %v2128_v36 }
  0x64   : > { %1974 = vmatprep.subr.bf16.mxu0 %v2191_v1 }
  0x66   : > { %1951 = vmatmul.mubr.bf16.vlgmr.msra.gmra.mrb[8].mxu0 %v2283_v12 }
  0x67   : > { %1990 = vmatprep.mubr.msk.bf16.mxu0 %vm2192_vm0, %v2191_v1  ;;  %1975 = vmatpush3.bf16.msra.mxu0 %v2129_v37 }
  0x68   : > { %1976 = vmatprep.subr.bf16.mxu0 %v2191_v1 }
  0x6b   : > { %1977 = vmatpush3.bf16.msra.mxu0 %v2130_v38 }
  0x6c   : > { %1978 = vmatprep.subr.bf16.mxu0 %v2191_v1 }
  0x6f   : > { %1979 = vmatpush3.bf16.msra.mxu0 %v2132_v40  ;;  %v2147_v40 = vld [vmem:[%s2621_s3 + $0x80] sm:$0xff]  }
  0x70   : > { %1980 = vmatprep.subr.bf16.mxu0 %v2191_v1 }
  0x73   : > { %1981 = vmatpush3.bf16.msra.mxu0 %v2134_v43  ;;  %v2149_v43 = vld [vmem:[%s2621_s3 + $0x90] sm:$0xff]  }
  0x74   : > { %1982 = vmatprep.subr.bf16.mxu0 %v2191_v1 }
  0x77   : > { %1983 = vmatpush3.bf16.msra.mxu0 %v2136_v45  ;;  %v2151_v45 = vld [vmem:[%s2621_s3 + $0xa0] sm:$0xff]  }
  0x78   : > { %1984 = vmatprep.subr.bf16.mxu0 %v2191_v1 }
  0x7b   : > { %1985 = vmatpush3.bf16.msra.mxu0 %v2138_v47  ;;  %v2153_v47 = vld [vmem:[%s2621_s3 + $0xb0] sm:$0xff]  }
  0x7c   : > { %1986 = vmatprep.subr.bf16.mxu0 %v2191_v1 }
  0x7f   : > { %1987 = vmatpush3.bf16.msra.mxu0 %v2140_v49 }
  0x80   : > { %1988 = vmatprep.subr.bf16.mxu0 %v2191_v1 }
  0x83   : > { %1989 = vmatpush3.bf16.msra.mxu0 %v2142_v51 }
  0xf9   : > { %v458_v54 = vpop.f32.mrb[0].mxu0 }
  0xfa   : > { %v1912_v55 = vpop.f32.mrb[1].mxu0 }
  0xfb   : > { %v461_v56 = vpop.f32.mrb[2].mxu0  ;;  %v2161_v55 = vld [vmem:[%s2623_s5 + $0x50] sm:$0xff]  }
  0xfc   : > { %v1913_v57 = vpop.f32.mrb[3].mxu0 }
  0xfd   : > { %v2163_v57 = vld [vmem:[%s2623_s5 + $0x60] sm:$0xff]  }
 0x119   : > { %v548_v58 = vpop.f32.mrb[4].mxu0 }
 0x11a   : > { %v549_v59 = vadd.f32 %v548_v58, %v458_v54  ;;  %v1932_v60 = vpop.f32.mrb[5].mxu0  ;;  %v2160_v54 = vld [vmem:[%s2623_s5 + $0x48] sm:$0xff]  }
 0x11b   : > { %v551_v61 = vpop.f32.mrb[6].mxu0  ;;  %v2164_v58 = vld [vmem:[%s2623_s5 + $0x68] sm:$0xff]  }
 0x11c   : > { %v552_v62 = vadd.f32 %v551_v61, %v461_v56  ;;  %v1933_v63 = vpop.f32.mrb[7].mxu0  ;;  %v2162_v56 = vld [vmem:[%s2623_s5 + $0x58] sm:$0xff]  }
 0x139   : > { %v659_v0 = vpop.f32.mrb[8].mxu0 }
 0x13a   : > { %v666_v3 = vadd.f32 %v659_v0, %v549_v59  ;;  %v1952_v4 = vpop.f32.mrb[9].mxu0 }
 0x13b   : > { %v662_v5 = vpop.f32.mrb[10].mxu0 }
 0x13c   : > { %v675_v6 = vadd.f32 %v1676_v2, %v666_v3  ;;  %v667_v7 = vadd.f32 %v662_v5, %v552_v62  ;;  %v1953_v8 = vpop.f32.mrb[11].mxu0 }
 0x13e   : > { %v677_v9 = vmax.f32 %v675_v6, 0.0  ;;  %v676_v10 = vadd.f32 %v1676_v2, %v667_v7  ;;  %v1737_v7 = vld [vmem:[%s2622_s4] ss:$0 sm:$0xff] }
 0x140   : > { %v1805_v11 = vpack.c.bf16 %v677_v9, %v677_v9  ;;  %v678_v12 = vmax.f32 %v676_v10, 0.0 }
 0x142   : > { %v692_v13 = vshrl.u32 %v1805_v11, 16  ;;  %v1806_v14 = vpack.c.bf16 %v678_v12, %v678_v12  ;;  %v695_v16 = vshll.u32 %v1805_v11, 16 }
 0x144   : > { %v694_v15 = vrot.slane %v692_v13, 7  ;;  %v700_v17 = vshrl.u32 %v1806_v14, 16  ;;  %v703_v23 = vshll.u32 %v1806_v14, 16 }
 0x146   : > { %v697_v20 = vor.u32 %v695_v16, %v694_v15  ;;  %v702_v22 = vrot.slane %v700_v17, 7  ;;  %v698_v26 = vrot.slane %v694_v15, 4 }
 0x148   : > { %v715_v27 = vsel %vm2433_vm8, %v697_v20, %v714_v19  ;;  %v705_v28 = vor.u32 %v703_v23, %v702_v22  ;;  %v707_v29 = vrot.slane %v702_v22, 4 }
 0x149   : > { %716 = vst [vmem:[#allocation2] sm:$0xf] %v715_v27 }
 0x14a   : > { %v706_v30 = vsel %vm2437_vm9, %v698_v26, %v705_v28  ;;  %v721_v31 = vsel %vm2441_vm10, %v707_v29, %v720_v25  ;;  %v1113_v26 = vld [vmem:[#allocation3] sm:$0xf] }
 0x14b   : > { %717 = vst [vmem:[#allocation2 + $0x4] sm:$0xf] %v706_v30  ;;  %722 = vst [vmem:[#allocation2 + $0x8] sm:$0x1] %v721_v31  ;;  %v1117_v30 = vld [vmem:[#allocation3 + $0x8] sm:$0x1] }
 0x152   : > { %v2144_v32 = vld [vmem:[#allocation2] sm:$0xff]   ;;  %v2146_v33 = vld [vmem:[#allocation2 + $0x8] ss:$0 sps:$4 sm:$0xff]  }
 0x153   : > { %1991 = vmatmul.mubr.bf16.vlgmr.msra.gmra.mrb[12].mxu0 %v2144_v32  ;;  %v770_v34 = vshll.u32 %v2144_v32, 16  ;;  %v775_v35 = vshll.u32 %v2146_v33, 16  ;;  %v768_v36 = vshrl.u32 %v2144_v32, 16  ;;  %v976_v49 = vrot.slane %v2144_v32, 1 }
 0x154   : > { %v977_v50 = vrot.slane %v2146_v33, 1  ;;  %2018 = vmatprep.mubr.msk.bf16.mxu0 %vm1143_vm11, %v2157_v52  ;;  %v2173_v52 = vld [vmem:[%s2623_s5 + $0x30] sm:$0xff]  }
 0x155   : > { %v772_v37 = vrot.slane %v770_v34, 1  ;;  %v777_v39 = vrot.slane %v775_v35, 1 }
 0x156   : > { %v978_v51 = vsel %vm572_vm1, %v976_v49, %v977_v50  ;;  %v2170_v49 = vld [vmem:[%s2623_s5 + $0x18] sm:$0xff]   ;;  %v2171_v50 = vld [vmem:[%s2623_s5 + $0x20] sm:$0xff]  }
 0x157   : > { %v773_v38 = vor.u32 %v772_v37, %v768_v36 }
 0x159   : > { %v778_v41 = vsel %vm362_vm2, %v773_v38, %v777_v39  ;;  %v2158_v39 = vld [vmem:[%s2624_s6 + $0x8] ss:$0 sps:$4 sm:$0xff]  }
 0x15a   : > { %1971 = vmatmul.mubr.bf16.vlgmr.msra.gmra.mrb[0].mxu1 %v778_v41 }
 0x15b   : > { %1995 = vmatpush3.bf16.msra.mxu1 %v2147_v40  ;;  %2010 = vmatprep.mubr.msk.bf16.mxu1 %vm2192_vm0, %v2191_v1 }
 0x15c   : > { %1996 = vmatprep.subr.bf16.mxu1 %v2191_v1 }
 0x15f   : > { %1997 = vmatpush3.bf16.msra.mxu1 %v2148_v42 }
 0x160   : > { %1998 = vmatprep.subr.bf16.mxu1 %v2191_v1 }
 0x163   : > { %1999 = vmatpush3.bf16.msra.mxu1 %v2149_v43 }
 0x164   : > { %2000 = vmatprep.subr.bf16.mxu1 %v2191_v1 }
 0x167   : > { %2001 = vmatpush3.bf16.msra.mxu1 %v2150_v44 }
 0x168   : > { %2002 = vmatprep.subr.bf16.mxu1 %v2191_v1 }
 0x16b   : > { %2003 = vmatpush3.bf16.msra.mxu1 %v2151_v45  ;;  %v2167_v45 = vld [vmem:[%s2623_s5] sm:$0xff]  }
 0x16c   : > { %2004 = vmatprep.subr.bf16.mxu1 %v2191_v1 }
 0x16f   : > { %2005 = vmatpush3.bf16.msra.mxu1 %v2152_v46 }
 0x170   : > { %2006 = vmatprep.subr.bf16.mxu1 %v2191_v1 }
 0x173   : > { %2007 = vmatpush3.bf16.msra.mxu1 %v2153_v47  ;;  %v2168_v47 = vld [vmem:[%s2623_s5 + $0x8] sm:$0xff]  }
 0x174   : > { %2008 = vmatprep.subr.bf16.mxu1 %v2191_v1 }
 0x177   : > { %2009 = vmatpush3.bf16.msra.mxu1 %v2154_v48  ;;  %v2169_v48 = vld [vmem:[%s2623_s5 + $0x10] sm:$0xff]  }
 0x178   : > { %2022 = vmatprep.subr.bf16.mxu1 %v2191_v1 }
 0x17a   : > { %2011 = vmatmul.mubr.bf16.vlgmr.msra.gmra.mrb[4].mxu1 %v978_v51  ;;  %v2172_v51 = vld [vmem:[%s2623_s5 + $0x28] sm:$0xff]  }
 0x17b   : > { %2038 = vmatprep.mubr.msk.bf16.mxu1 %vm2192_vm0, %v2191_v1  ;;  %2023 = vmatpush3.bf16.msra.mxu1 %v2159_v53  ;;  %v2174_v53 = vld [vmem:[%s2623_s5 + $0x38] sm:$0xff]  }
 0x17c   : > { %2024 = vmatprep.subr.bf16.mxu1 %v2191_v1 }
 0x17f   : > { %2025 = vmatpush3.bf16.msra.mxu1 %v2160_v54  ;;  %v2175_v54 = vld [vmem:[%s2623_s5 + $0x80] sm:$0xff]  }
 0x180   : > { %2026 = vmatprep.subr.bf16.mxu1 %v2191_v1 }
 0x183   : > { %2027 = vmatpush3.bf16.msra.mxu1 %v2161_v55  ;;  %v2176_v55 = vld [vmem:[%s2623_s5 + $0x88] sm:$0xff]  }
 0x184   : > { %2028 = vmatprep.subr.bf16.mxu1 %v2191_v1 }
 0x187   : > { %2029 = vmatpush3.bf16.msra.mxu1 %v2162_v56  ;;  %v2177_v56 = vld [vmem:[%s2623_s5 + $0x90] sm:$0xff]  }
 0x188   : > { %2030 = vmatprep.subr.bf16.mxu1 %v2191_v1 }
 0x18b   : > { %2031 = vmatpush3.bf16.msra.mxu1 %v2163_v57  ;;  %v2178_v57 = vld [vmem:[%s2623_s5 + $0x98] sm:$0xff]  }
 0x18c   : > { %2032 = vmatprep.subr.bf16.mxu1 %v2191_v1 }
 0x18f   : > { %2033 = vmatpush3.bf16.msra.mxu1 %v2164_v58  ;;  %v2179_v58 = vld [vmem:[%s2623_s5 + $0xa0] sm:$0xff]  }
 0x190   : > { %2034 = vmatprep.subr.bf16.mxu1 %v2191_v1 }
 0x193   : > { %2035 = vmatpush3.bf16.msra.mxu1 %v2165_v21 }
 0x194   : > { %2036 = vmatprep.subr.bf16.mxu1 %v2191_v1 }
 0x197   : > { %2037 = vmatpush3.bf16.msra.mxu1 %v2166_v24 }
 0x198   : > { %2042 = vmatprep.subr.bf16.mxu1 %v2191_v1 }
 0x226   : > { %v952_v59 = vpop.f32.mrb[12].mxu0 }
 0x227   : > { %v1992_v60 = vpop.f32.mrb[13].mxu0 }
 0x228   : > { %v955_v61 = vpop.f32.mrb[14].mxu0  ;;  %v2181_v60 = vld [vmem:[%s2623_s5 + $0xb0] sm:$0xff]  }
 0x229   : > { %v1993_v62 = vpop.f32.mrb[15].mxu0 }
 0x22d   : > { %v862_v63 = vpop.f32.mrb[0].mxu1 }
 0x22e   : > { %v953_v0 = vadd.f32 %v952_v59, %v862_v63  ;;  %v1972_v2 = vpop.f32.mrb[1].mxu1  ;;  %v2180_v59 = vld [vmem:[%s2623_s5 + $0xa8] sm:$0xff]  }
 0x22f   : > { %v865_v3 = vpop.f32.mrb[2].mxu1 }
 0x230   : > { %v956_v4 = vadd.f32 %v955_v61, %v865_v3  ;;  %v1973_v5 = vpop.f32.mrb[3].mxu1  ;;  %v2182_v61 = vld [vmem:[%s2623_s5 + $0xb8] sm:$0xff]  }
 0x24d   : > { %v1062_v6 = vpop.f32.mrb[4].mxu1 }
 0x24e   : > { %v1069_v8 = vadd.f32 %v1062_v6, %v953_v0  ;;  %v2012_v9 = vpop.f32.mrb[5].mxu1 }
 0x24f   : > { %v1065_v10 = vpop.f32.mrb[6].mxu1 }
 0x250   : > { %v1078_v11 = vadd.f32 %v1737_v7, %v1069_v8  ;;  %v1070_v12 = vadd.f32 %v1065_v10, %v956_v4  ;;  %v2013_v13 = vpop.f32.mrb[7].mxu1 }
 0x252   : > { %v1080_v14 = vmax.f32 %v1078_v11, 0.0  ;;  %v1079_v15 = vadd.f32 %v1737_v7, %v1070_v12 }
 0x254   : > { %1082 = vst [vmem:[%s312_s30] sm:$0xff] %v1080_v14  ;;  %v1807_v16 = vpack.c.bf16 %v1080_v14, %v1080_v14  ;;  %v1081_v17 = vmax.f32 %v1079_v15, 0.0 }
 0x256   : > { %v1094_v19 = vshrl.u32 %v1807_v16, 16  ;;  %1083 = vst [vmem:[%s312_s30 + $0x8] sm:$0xff] %v1081_v17  ;;  %v1808_v20 = vpack.c.bf16 %v1081_v17, %v1081_v17  ;;  %v1097_v23 = vshll.u32 %v1807_v16, 16 }
 0x258   : > { %v1096_v22 = vrot.slane %v1094_v19, 7  ;;  %v1102_v25 = vshrl.u32 %v1808_v20, 16  ;;  %v1105_v29 = vshll.u32 %v1808_v20, 16 }
 0x25a   : > { %v1099_v27 = vor.u32 %v1097_v23, %v1096_v22  ;;  %v1104_v28 = vrot.slane %v1102_v25, 7  ;;  %v1100_v31 = vrot.slane %v1096_v22, 4 }
 0x25c   : > { %v1114_v32 = vsel %vm2433_vm8, %v1099_v27, %v1113_v26  ;;  %v1107_v33 = vor.u32 %v1105_v29, %v1104_v28  ;;  %v1109_v34 = vrot.slane %v1104_v28, 4 }
 0x25d   : > { %1115 = vst [vmem:[#allocation3] sm:$0xf] %v1114_v32 }
 0x25e   : > { %v1108_v35 = vsel %vm2437_vm9, %v1100_v31, %v1107_v33  ;;  %v1118_v36 = vsel %vm2441_vm10, %v1109_v34, %v1117_v30 }
 0x25f   : > { %1116 = vst [vmem:[#allocation3 + $0x4] sm:$0xf] %v1108_v35  ;;  %1119 = vst [vmem:[#allocation3 + $0x8] sm:$0x1] %v1118_v36 }
 0x266   : > { %v2155_v37 = vld [vmem:[#allocation3] sm:$0xff]   ;;  %v2156_v38 = vld [vmem:[#allocation3 + $0x8] ss:$0 sps:$4 sm:$0xff]  }
 0x267   : > { %2014 = vmatprep.subr.bf16.mxu0 %v2155_v37  ;;  %v1152_v18 = vsel %vm711_vm3, %v2156_v38, 0 }
 0x268   : > { %2015 = vmatpush3.bf16.msra.mxu0 %v2155_v37 }
 0x269   : > { %2090 = vmatprep.subr.msk.bf16.mxu0 %vm711_vm3, %v2156_v38 }
 0x26c   : > { %2017 = vmatpush3.bf16.msra.mxu0 %v1152_v18 }
 0x26f   : > { %2019 = vmatmul.mubr.msk.bf16.vlgmr.msra.gmra.mrb[16].mxu0 %vm1143_vm11, %v2158_v39 }
 0x342   : > { %v2020_v40 = vpop.f32.mrb[16].mxu0 }
 0x343   : > { %v1188_v41 = vpop.f32.mrb[17].mxu0  ;;  %v1203_v62 = vpack.c.bf16 %v2020_v40, %v2020_v40 }
 0x344   : > { %v2021_v42 = vpop.f32.mrb[18].mxu0 }
 0x345   : > { %v1191_v43 = vpop.f32.mrb[19].mxu0 }
 0x346   : > { %v1202_v44 = vpack.c.bf16 %v1191_v43, %v1188_v41 }
 0x348   : > { %v1238_v46 = vrot.slane %v1202_v44, 4 }
 0x34a   : > { %2039 = vmatmul.mubr.bf16.vlgmr.msra.gmra.mrb[8].mxu1 %v1238_v46 }
 0x34b   : > { %2043 = vmatpush3.bf16.msra.mxu1 %v2167_v45  ;;  %2058 = vmatprep.mubr.msk.bf16.mxu1 %vm2192_vm0, %v2191_v1 }
 0x34c   : > { %2044 = vmatprep.subr.bf16.mxu1 %v2191_v1 }
 0x34f   : > { %2045 = vmatpush3.bf16.msra.mxu1 %v2168_v47 }
 0x350   : > { %2046 = vmatprep.subr.bf16.mxu1 %v2191_v1 }
 0x353   : > { %2047 = vmatpush3.bf16.msra.mxu1 %v2169_v48 }
 0x354   : > { %2048 = vmatprep.subr.bf16.mxu1 %v2191_v1 }
 0x357   : > { %2049 = vmatpush3.bf16.msra.mxu1 %v2170_v49 }
 0x358   : > { %2050 = vmatprep.subr.bf16.mxu1 %v2191_v1 }
 0x35b   : > { %2051 = vmatpush3.bf16.msra.mxu1 %v2171_v50 }
 0x35c   : > { %2052 = vmatprep.subr.bf16.mxu1 %v2191_v1 }
 0x35f   : > { %2053 = vmatpush3.bf16.msra.mxu1 %v2172_v51 }
 0x360   : > { %2054 = vmatprep.subr.bf16.mxu1 %v2191_v1 }
 0x363   : > { %2055 = vmatpush3.bf16.msra.mxu1 %v2173_v52 }
 0x364   : > { %2056 = vmatprep.subr.bf16.mxu1 %v2191_v1 }
 0x367   : > { %2057 = vmatpush3.bf16.msra.mxu1 %v2174_v53 }
 0x368   : > { %2062 = vmatprep.subr.bf16.mxu1 %v2191_v1 }
 0x36a   : > { %2059 = vmatmul.mubr.bf16.vlgmr.msra.gmra.mrb[8].mxu1 %v1202_v44 }
 0x36b   : > { %2063 = vmatpush3.bf16.msra.mxu1 %v2175_v54  ;;  %2078 = vmatprep.mubr.msk.bf16.mxu1 %vm2192_vm0, %v2191_v1 }
 0x36c   : > { %2064 = vmatprep.subr.bf16.mxu1 %v2191_v1 }
 0x36f   : > { %2065 = vmatpush3.bf16.msra.mxu1 %v2176_v55 }
 0x370   : > { %2066 = vmatprep.subr.bf16.mxu1 %v2191_v1 }
 0x373   : > { %2067 = vmatpush3.bf16.msra.mxu1 %v2177_v56 }
 0x374   : > { %2068 = vmatprep.subr.bf16.mxu1 %v2191_v1 }
 0x377   : > { %2069 = vmatpush3.bf16.msra.mxu1 %v2178_v57 }
 0x378   : > { %2070 = vmatprep.subr.bf16.mxu1 %v2191_v1 }
 0x37b   : > { %2071 = vmatpush3.bf16.msra.mxu1 %v2179_v58 }
 0x37c   : > { %2072 = vmatprep.subr.bf16.mxu1 %v2191_v1 }
 0x37f   : > { %2073 = vmatpush3.bf16.msra.mxu1 %v2180_v59 }
 0x380   : > { %2074 = vmatprep.subr.bf16.mxu1 %v2191_v1 }
 0x383   : > { %2075 = vmatpush3.bf16.msra.mxu1 %v2181_v60 }
 0x384   : > { %2076 = vmatprep.subr.bf16.mxu1 %v2191_v1 }
 0x387   : > { %2077 = vmatpush3.bf16.msra.mxu1 %v2182_v61 }
 0x38a   : > { %2079 = vmatmul.mubr.bf16.vlgmr.msra.gmra.mrb[8].mxu1 %v1203_v62 }
 0x45d   : > { %v1515_v63 = vpop.f32.mrb[8].mxu1 }
 0x45e   : > { %1522 = vst [vmem:[%s316_s10] sm:$0xff] %v1515_v63  ;;  %v2080_v0 = vpop.f32.mrb[9].mxu1 }
 0x45f   : > { %v1518_v2 = vpop.f32.mrb[10].mxu1 }
 0x460   : > { %v2081_v3 = vpop.f32.mrb[11].mxu1 }
 0x461 PF: > { %s19_s27 = sadd.s32 1, %s2189_s27  }
 0x462   : > { %p16_p4 = scmp.ge.s32.totalorder %s19_s27, 4  }
 0x464   :  { %18 = sbr.rel (!%p16_p4) target bundleno = 1 (0x1), region = 96 }

</bundles_post_ra>
